<compile_context>
chip_gen: v7x
topology: tpu7x:2x2x1
jax: 0.10.0
libtpu: 0.0.40
codegen_flags: <defaults>
</compile_context>

<pallas_src>
import functools

import jax
import jax.numpy as jnp
import numpy as np
from jax.experimental import pallas as pl
from jax.experimental.pallas import tpu as pltpu

CHANNELS = 4  # matches the module-level `channels` the PyTorch script relies on

# a + b + out byte budget for the single-block VMEM path (safe on all gens).
_SMALL_BLOCK_TOTAL_BYTES = 2 << 20


def _concat_vmem_kernel(a_ref, b_ref, o_ref, *, split):
    # `split` is a multiple of 128 on this path -> both halves are unmasked,
    # lane-dense vector stores.
    o_ref[:, :split] = a_ref[...]
    o_ref[:, split:] = b_ref[...]


def _concat_dma_kernel(a_hbm, b_hbm, o_hbm, sem, *, chw, rows_per_step):
    # Direct HBM->HBM strided DMA: no VMEM round-trip, purely DMA/HBM-BW bound.
    start = pl.program_id(0) * rows_per_step
    rows = pl.ds(start, rows_per_step)
    cp_a = pltpu.make_async_copy(a_hbm.at[rows, :], o_hbm.at[rows, pl.ds(0, chw)], sem.at[0])
    cp_b = pltpu.make_async_copy(b_hbm.at[rows, :], o_hbm.at[rows, pl.ds(chw, chw)], sem.at[1])
    cp_a.start()
    cp_b.start()
    cp_a.wait()
    cp_b.wait()


def concat_channels(x1, x2):
    """Pallas equivalent of torch.cat([x1, x2], dim=1) for NCHW tensors."""
    assert x1.shape == x2.shape and x1.dtype == x2.dtype
    N, C, H, W = x1.shape
    CHW = C * H * W
    a = x1.reshape(N, CHW)
    b = x2.reshape(N, CHW)

    itemsize = jnp.dtype(x1.dtype).itemsize
    total_bytes = 4 * N * CHW * itemsize  # two inputs + (2x-sized) output
    out_shape = jax.ShapeDtypeStruct((N, 2 * CHW), x1.dtype)

    if total_bytes <= _SMALL_BLOCK_TOTAL_BYTES and CHW % 128 == 0:
        # Tiny + lane-aligned: one VMEM block, grid=(), zero per-step overhead.
        out = pl.pallas_call(
            functools.partial(_concat_vmem_kernel, split=CHW),
            out_shape=out_shape,
            in_specs=[
                pl.BlockSpec((N, CHW), lambda: (0, 0)),
                pl.BlockSpec((N, CHW), lambda: (0, 0)),
            ],
            out_specs=pl.BlockSpec((N, 2 * CHW), lambda: (0, 0)),
            compiler_params=pltpu.CompilerParams(
                vmem_limit_bytes=int(min(max(4 * total_bytes, 4 << 20), 12 << 20)),
            ),
        )(a, b)
    else:
        # Large or unaligned shapes: pure HBM->HBM DMA.  Split rows across two
        # grid steps when possible so v7x's two TensorCores both issue DMAs.
        num_splits = 2 if (N >= 2 and N % 2 == 0) else 1
        rows_per_step = N // num_splits
        out = pl.pallas_call(
            functools.partial(_concat_dma_kernel, chw=CHW, rows_per_step=rows_per_step),
            out_shape=out_shape,
            grid=(num_splits,),
            in_specs=[
                pl.BlockSpec(memory_space=pl.ANY),
                pl.BlockSpec(memory_space=pl.ANY),
            ],
            out_specs=pl.BlockSpec(memory_space=pl.ANY),
            scratch_shapes=[pltpu.SemaphoreType.DMA((2,))],
            compiler_params=pltpu.CompilerParams(
                dimension_semantics=("parallel",) if num_splits > 1 else ("arbitrary",),
            ),
        )(a, b)

    return out.reshape(N, 2 * C, H, W)


def net_forward(images_input):
    """Mirror of Net.forward: channel-concat of the two input images."""
    x1, x2 = images_input
    return concat_channels(x1, x2)


def build_conv_weights(channels):
    """Deterministic weights exactly as in Net.__init__ (1x1 selector convs)."""
    w1 = np.zeros((channels * 2, channels, 1, 1), dtype=np.float32)
    w2 = np.zeros((channels * 2, channels, 1, 1), dtype=np.float32)
    for c in range(channels):
        w1[c, c, 0, 0] = 1.0
        w2[c + channels, c, 0, 0] = 1.0
    return jnp.asarray(w1), jnp.asarray(w2)


def forward_alt_ref(x1, x2, w1, w2):
    """Plain-JAX reference of Net.forward_alt (1x1 convs as einsums)."""
    y1 = jnp.einsum("oc,nchw->nohw", w1[:, :, 0, 0], x1)
    y2 = jnp.einsum("oc,nchw->nohw", w2[:, :, 0, 0], x2)
    return y1 + y2


if __name__ == "__main__":
    key = jax.random.PRNGKey(0)
    k1, k2, k3, k4, k5, k6 = jax.random.split(key, 6)

    # Main case (VMEM single-block path): N=2, C=4, H=W=16.
    N, C, H, W = 2, CHANNELS, 16, 16
    x1 = jax.random.normal(k1, (N, C, H, W), dtype=jnp.float32)
    x2 = jax.random.normal(k2, (N, C, H, W), dtype=jnp.float32)
    out = jax.block_until_ready(net_forward((x1, x2)))
    ref_cat = jnp.concatenate([x1, x2], axis=1)
    w1, w2 = build_conv_weights(C)
    ref_alt = forward_alt_ref(x1, x2, w1, w2)
    np.testing.assert_allclose(np.asarray(out), np.asarray(ref_cat), rtol=0, atol=0)
    np.testing.assert_allclose(np.asarray(out), np.asarray(ref_alt), rtol=1e-6, atol=1e-6)

    # DMA path, split across 2 grid steps (even N, CHW not a multiple of 128).
    y1 = jax.random.normal(k3, (2, CHANNELS, 15, 15), dtype=jnp.float32)
    y2 = jax.random.normal(k4, (2, CHANNELS, 15, 15), dtype=jnp.float32)
    out_dma2 = jax.block_until_ready(net_forward((y1, y2)))
    np.testing.assert_allclose(
        np.asarray(out_dma2), np.asarray(jnp.concatenate([y1, y2], axis=1)), rtol=0, atol=0)

    # DMA path, single grid step (odd N).
    z1 = jax.random.normal(k5, (3, CHANNELS, 15, 15), dtype=jnp.float32)
    z2 = jax.random.normal(k6, (3, CHANNELS, 15, 15), dtype=jnp.float32)
    out_dma1 = jax.block_until_ready(net_forward((z1, z2)))
    np.testing.assert_allclose(
        np.asarray(out_dma1), np.asarray(jnp.concatenate([z1, z2], axis=1)), rtol=0, atol=0)

    print("KERNEL_OK")
</pallas_src>

<mosaic_0001>
module attributes {stable_mosaic.version = 11 : i64} {
  func.func @_concat_vmem_kernel(%arg0: memref<2x1024xf32, #tpu.memory_space<vmem>>, %arg1: memref<2x1024xf32, #tpu.memory_space<vmem>>, %arg2: memref<2x2048xf32, #tpu.memory_space<vmem>>) attributes {dimension_semantics = [], scalar_prefetch = 0 : i64, scratch_operands = 0 : i64, tpu.core_type = #tpu.core_type<tc>} {
    %c0 = arith.constant 0 : index
    %c0_0 = arith.constant 0 : index
    %0 = vector.load %arg0[%c0, %c0_0] : memref<2x1024xf32, #tpu.memory_space<vmem>>, vector<2x1024xf32>
    %c0_1 = arith.constant 0 : index
    %c0_2 = arith.constant 0 : index
    %1 = vector.load %arg2[%c0_1, %c0_2] : memref<2x2048xf32, #tpu.memory_space<vmem>>, vector<2x1024xf32>
    tpu.vector_store %arg2[%c0_1, %c0_2], %0 {strides = array<i32>} : memref<2x2048xf32, #tpu.memory_space<vmem>>, vector<2x1024xf32>,
    %c0_3 = arith.constant 0 : index
    %c0_4 = arith.constant 0 : index
    %2 = vector.load %arg1[%c0_3, %c0_4] : memref<2x1024xf32, #tpu.memory_space<vmem>>, vector<2x1024xf32>
    %c0_5 = arith.constant 0 : index
    %c1024 = arith.constant 1024 : index
    %3 = vector.load %arg2[%c0_5, %c1024] : memref<2x2048xf32, #tpu.memory_space<vmem>>, vector<2x1024xf32>
    tpu.vector_store %arg2[%c0_5, %c1024], %2 {strides = array<i32>} : memref<2x2048xf32, #tpu.memory_space<vmem>>, vector<2x1024xf32>,
    return
  }
}

</mosaic_0001>

<bundles_post_ra>
// kernel: tpu_custom_call.1
= control target key start
LH: loop header
LB: loop body
LE: loop exit
PB: predicated region body
PF: predicated region fallthrough
CT: control target
= control target key end

     0   :  { %7 = vsyncpa [#allocation3], 0  ;;  %s189_s0 = inlined_call_operand.hbm [shape: f32[2,1024], index: 0, kind: input, shape index: {}]   ;;  %s190_s1 = inlined_call_operand.hbm [shape: f32[2,1024], index: 1, kind: input, shape index: {}]   ;;  %s191_s2 = inlined_call_operand.hbm [shape: f32[2,2048], index: 2, kind: output, shape index: {}]  }
   0x1   :  { %8 = vsyncpa [#allocation6], 0 }
   0x2   :  { %9 = vsyncpa [#allocation4], 0  ;;  %s135_s9 = smov [#allocation2]   ;;  %s136_s11 = smov [#allocation5]  }
   0x3   :  { %s16_s10 = sshll.u32 %s135_s9, 4  ;;  %s26_s12 = sshll.u32 %s136_s11, 4  ;;  %s17_s10 = int_to_ptr.vmem [resolvable:$true] %s16_s10  ;;  %s27_s12 = int_to_ptr.vmem [resolvable:$true] %s26_s12 }
   0x4   :  { %s63_s15 = scalar_lea.hbm %s189_s0, 256 }
   0x5   :  { %p64_p0 = scmp.ne.s32.totalorder %s189_s0, %s63_s15  ;;  %p67_p1 = scmp.lt.u32.totalorder %s63_s15, %s189_s0 }
   0x7   :  { %p69_p2 = pnand %p67_p1, %p64_p0 }
   0x9   :  { %72 = shalt.err (!%p69_p2)
}
   0xa   :  { %s73_s20 = scalar_lea.vmem %s17_s10, 256  ;;  %p78_p4 = scmp.lt.s32.totalorder %s17_s10, %s17_s10 }
   0xb   :  { %p74_p3 = scmp.ne.s32.totalorder %s17_s10, %s73_s20  ;;  %p79_p5 = scmp.lt.s32.totalorder %s73_s20, %s73_s20 }
   0xd   :  { %p80_p6 = por %p79_p5, %p78_p4 }
   0xf   :  { %p81_p7 = pnand %p80_p6, %p74_p3 }
  0x11   :  { %84 = shalt.err (!%p81_p7)
}
  0x12   :  { %19 = dma.hbm_to_vmem [thread:$0]  %s189_s0, 256, %s17_s10, [#allocation3]  }
  0x13   :  { %s85_s25 = scalar_lea.hbm %s190_s1, 256 }
  0x14   :  { %p86_p8 = scmp.ne.s32.totalorder %s190_s1, %s85_s25  ;;  %p89_p9 = scmp.lt.u32.totalorder %s85_s25, %s190_s1 }
  0x16   :  { %p91_p10 = pnand %p89_p9, %p86_p8 }
  0x18   :  { %94 = shalt.err (!%p91_p10)
}
  0x19   :  { %s95_s30 = scalar_lea.vmem %s27_s12, 256  ;;  %p100_p12 = scmp.lt.s32.totalorder %s27_s12, %s27_s12 }
  0x1a   :  { %p96_p11 = scmp.ne.s32.totalorder %s27_s12, %s95_s30  ;;  %p101_p13 = scmp.lt.s32.totalorder %s95_s30, %s95_s30 }
  0x1c   :  { %p102_p0 = por %p101_p13, %p100_p12 }
  0x1e   :  { %p103_p1 = pnand %p102_p0, %p96_p11 }
  0x20   :  { %106 = shalt.err (!%p103_p1)
}
  0x21   :  { %29 = dma.hbm_to_vmem [thread:$0]  %s190_s1, 256, %s27_s12, [#allocation6]  }
  0x22   :  { %129 = dma.done.wait [#allocation3], 256  }
  0x23   :  { %130 = vsyncadd [#allocation3], 4294967040 }
  0x24   :  { %131 = dma.done.wait [#allocation6], 256  }
  0x25   :  { %132 = vsyncadd [#allocation6], 4294967040  ;;  %s137_s4 = smov [#allocation7]   ;;  %v36_v0 = vld [vmem:[#allocation2] sm:$0xff]  ;;  %v37_v1 = vld [vmem:[#allocation2 + $0x8] sm:$0xff] }
  0x26   :  { %s50_s5 = sshll.u32 %s137_s4, 4  ;;  %v40_v2 = vld [vmem:[#allocation5] sm:$0xff]  ;;  %38 = vst [vmem:[#allocation7] sm:$0xff] %v36_v0  ;;  %39 = vst [vmem:[#allocation7 + $0x8] sm:$0xff] %v37_v1  ;;  %v41_v3 = vld [vmem:[#allocation5 + $0x8] sm:$0xff]  ;;  %s51_s5 = int_to_ptr.vmem [resolvable:$true] %s50_s5 }
  0x27   :  { %42 = vst [vmem:[#allocation7 + $0x10] sm:$0xff] %v40_v2  ;;  %43 = vst [vmem:[#allocation7 + $0x18] sm:$0xff] %v41_v3  ;;  %s107_s6 = scalar_lea.vmem %s51_s5, 512  ;;  %p112_p3 = scmp.lt.s32.totalorder %s51_s5, %s51_s5 }
  0x28   :  { %p108_p2 = scmp.ne.s32.totalorder %s51_s5, %s107_s6  ;;  %p113_p4 = scmp.lt.s32.totalorder %s107_s6, %s107_s6 }
  0x2a   :  { %p114_p5 = por %p113_p4, %p112_p3 }
  0x2c   :  { %p115_p6 = pnand %p114_p5, %p108_p2 }
  0x2e   :  { %118 = shalt.err (!%p115_p6)
}
  0x2f   :  { %s119_s8 = scalar_lea.hbm %s191_s2, 512 }
  0x30   :  { %p120_p7 = scmp.ne.s32.totalorder %s191_s2, %s119_s8  ;;  %p123_p8 = scmp.lt.u32.totalorder %s119_s8, %s191_s2 }
  0x32   :  { %p125_p9 = pnand %p123_p8, %p120_p7 }
  0x34   :  { %128 = shalt.err (!%p125_p9)
}
  0x35   :  { %53 = dma.vmem_to_hbm [thread:$0]  %s51_s5, 512, %s191_s2, [#allocation4]  }
  0x36   :  { %133 = dma.done.wait [#allocation4], 512  }
  0x37   :  { %134 = vsyncadd [#allocation4], 4294966784 }
  0x38   :  { %57 = vsyncpa [#allocation3], 1 }
  0x39   :  { %58 = vsyncpa [#allocation6], 1 }
  0x3a   :  { %59 = vsyncpa [#allocation4], 1 }

</bundles_post_ra>
